<compile_context>
chip_gen: v7x
topology: tpu7x:2x2x1
jax: 0.10.0
libtpu: 0.0.40
codegen_flags: <defaults>
</compile_context>

<pallas_src>
import functools

import jax
import jax.numpy as jnp
from jax.experimental import pallas as pl
from jax.experimental.pallas import tpu as pltpu

HIDDEN = 256
LEAKY_SLOPE = 0.01   # torch.nn.LeakyReLU default negative_slope
SUBLANE = 8


def _round_up(x, m):
    return (x + m - 1) // m * m


def _mlp_kernel(x_ref, w1_ref, b1_ref, w2_ref, b2_ref, o_ref, *, precision):
    # Fused: matmul1 + bias + LeakyReLU + matmul2 + bias.
    # Cast x to the weight dtype in-kernel (zero extra HBM traffic); accumulate
    # and do all elementwise math in f32 regardless of compute dtype.
    x = x_ref[...].astype(w1_ref.dtype)
    h = jnp.dot(x, w1_ref[...],
                preferred_element_type=jnp.float32, precision=precision)
    h = h + b1_ref[...]
    h = jnp.where(h > 0, h, LEAKY_SLOPE * h)                  # LeakyReLU(0.01)
    logits = jnp.dot(h.astype(w2_ref.dtype), w2_ref[...],
                     preferred_element_type=jnp.float32, precision=precision)
    o_ref[...] = (logits + b2_ref[...]).astype(o_ref.dtype)


def prepare_params(w1, b1, w2, b2, compute_dtype=None):
    """One-time parameter prep (hoisted out of the per-call path).

    Cast the weights to the MXU compute dtype (e.g. jnp.bfloat16) once; biases
    stay f32 because they are added to the f32 accumulator in-kernel.
    """
    if compute_dtype is not None:
        w1 = w1.astype(compute_dtype)
        w2 = w2.astype(compute_dtype)
    return w1, b1, w2, b2


@functools.partial(jax.jit, static_argnames=("block_m", "out_dtype"))
def mlp_classifier_forward(x, w1, b1, w2, b2, *, block_m=4096,
                           out_dtype=jnp.float32):
    """x: (N, num_dim); w1: (num_dim, 256); b1: (1, 256);
       w2: (256, num_class); b2: (1, num_class) -> logits (N, num_class).

    Weights stored transposed vs torch ((in, out)) so the kernel computes
    x @ W + b on the MXU. The compute dtype follows the weight dtype (see
    prepare_params); x is cast inside the kernel.
    """
    n, num_dim = x.shape
    hidden = w1.shape[1]
    num_class = w2.shape[1]

    # Batch tile: multiple of 8 sublanes, capped so the grid has >= 2 steps
    # whenever possible (v7x has 2 TensorCores; "parallel" shards the axis).
    # n is NOT padded: cdiv grid + partial trailing block. OOB output rows are
    # masked on store; OOB input rows only ever feed those dropped rows.
    half = _round_up(pl.cdiv(n, 2), SUBLANE)
    bm = max(SUBLANE, min(_round_up(block_m, SUBLANE), half))
    grid = (pl.cdiv(n, bm),)

    f32_path = (x.dtype == jnp.float32) and (w1.dtype == jnp.float32)
    precision = jax.lax.Precision.HIGHEST if f32_path else None
    kernel = functools.partial(_mlp_kernel, precision=precision)

    return pl.pallas_call(
        kernel,
        out_shape=jax.ShapeDtypeStruct((n, num_class), out_dtype),
        grid_spec=pltpu.PrefetchScalarGridSpec(
            num_scalar_prefetch=0,
            grid=grid,
            in_specs=[
                # Tile only the batch dim; weights/biases use a constant block
                # index so Pallas keeps them resident (no re-DMA per step).
                pl.BlockSpec((bm, num_dim), lambda i: (i, 0)),
                pl.BlockSpec((num_dim, hidden), lambda i: (0, 0)),
                pl.BlockSpec((1, hidden), lambda i: (0, 0)),
                pl.BlockSpec((hidden, num_class), lambda i: (0, 0)),
                pl.BlockSpec((1, num_class), lambda i: (0, 0)),
            ],
            # Narrow, unpadded output block: last dim == full array dim (legal),
            # contiguous HBM destination, no wrapper-side slice needed.
            out_specs=pl.BlockSpec((bm, num_class), lambda i: (i, 0)),
        ),
        compiler_params=pltpu.CompilerParams(
            dimension_semantics=("parallel",)),
    )(x, w1, b1, w2, b2)


def xavier_uniform(key, fan_in, fan_out, dtype=jnp.float32):
    # matches torch.nn.init.xavier_uniform_ (gain=1.0)
    bound = (6.0 / (fan_in + fan_out)) ** 0.5
    # stored as (fan_in, fan_out) == transpose of torch's (out, in) weight
    return jax.random.uniform(key, (fan_in, fan_out), dtype, -bound, bound)


def init_params(key, num_dim, num_class):
    k1, k2 = jax.random.split(key)
    w1 = xavier_uniform(k1, num_dim, HIDDEN)
    b1 = jnp.zeros((1, HIDDEN), jnp.float32)
    w2 = xavier_uniform(k2, HIDDEN, num_class)
    b2 = jnp.zeros((1, num_class), jnp.float32)
    return w1, b1, w2, b2


def reference_forward(x, w1, b1, w2, b2):
    h = x @ w1 + b1
    h = jnp.where(h > 0, h, LEAKY_SLOPE * h)
    return h @ w2 + b2


if __name__ == "__main__":
    num_dim, num_class = 32, 10

    key = jax.random.PRNGKey(0)
    kx, kx2, kp = jax.random.split(key, 3)
    hg = None  # unused by the reference forward (kept for signature parity)
    w1, b1, w2, b2 = init_params(kp, num_dim, num_class)

    # Case 1: regular batch, f32 path (strict check).
    batch = 64
    x = jax.random.normal(kx, (batch, num_dim), jnp.float32)
    logits = mlp_classifier_forward(x, w1, b1, w2, b2)
    jax.block_until_ready(logits)
    ref = reference_forward(x, w1, b1, w2, b2)
    assert logits.shape == (batch, num_class)
    assert jnp.allclose(logits, ref, atol=1e-5, rtol=1e-5)

    # Case 2: ragged batch (not a multiple of 8) exercises the partial
    # trailing block (masked output stores, no wrapper-side pad).
    batch2 = 13
    x2 = jax.random.normal(kx2, (batch2, num_dim), jnp.float32)
    logits2 = mlp_classifier_forward(x2, w1, b1, w2, b2)
    jax.block_until_ready(logits2)
    ref2 = reference_forward(x2, w1, b1, w2, b2)
    assert logits2.shape == (batch2, num_class)
    assert jnp.allclose(logits2, ref2, atol=1e-5, rtol=1e-5)

    # Case 3: bf16 compute path — weights pre-cast once (call-invariant),
    # x cast in-kernel; f32 accumulation and f32 logits. Loose tolerance.
    w1b, b1b, w2b, b2b = prepare_params(w1, b1, w2, b2,
                                        compute_dtype=jnp.bfloat16)
    logits_bf16 = mlp_classifier_forward(x, w1b, b1b, w2b, b2b)
    jax.block_until_ready(logits_bf16)
    assert logits_bf16.shape == (batch, num_class)
    assert jnp.allclose(logits_bf16, ref, atol=1e-1, rtol=1e-1)

    print("KERNEL_OK")
</pallas_src>

<mosaic_0001>
module attributes {stable_mosaic.version = 11 : i64} {
  func.func @_mlp_kernel(%arg0: i32, %arg1: memref<32x32xf32, #tpu.memory_space<vmem>>, %arg2: memref<32x256xf32, #tpu.memory_space<vmem>>, %arg3: memref<1x256xf32, #tpu.memory_space<vmem>>, %arg4: memref<256x10xf32, #tpu.memory_space<vmem>>, %arg5: memref<1x10xf32, #tpu.memory_space<vmem>>, %arg6: memref<32x10xf32, #tpu.memory_space<vmem>>) attributes {dimension_semantics = [#tpu.dimension_semantics<parallel>], iteration_bounds = array<i64: 2>, scalar_prefetch = 0 : i64, scratch_operands = 0 : i64, tpu.core_type = #tpu.core_type<tc>, window_params = [{transform_indices = @transform_0, window_bounds = array<i64: 32, 32>}, {pipeline_mode = #tpu.pipeline_mode<synchronous>, transform_indices = @transform_1, window_bounds = array<i64: 32, 256>}, {pipeline_mode = #tpu.pipeline_mode<synchronous>, transform_indices = @transform_2, window_bounds = array<i64: 1, 256>}, {pipeline_mode = #tpu.pipeline_mode<synchronous>, transform_indices = @transform_3, window_bounds = array<i64: 256, 10>}, {pipeline_mode = #tpu.pipeline_mode<synchronous>, transform_indices = @transform_4, window_bounds = array<i64: 1, 10>}, {transform_indices = @transform_5, window_bounds = array<i64: 32, 10>}]} {
    %c0 = arith.constant 0 : index
    %c0_0 = arith.constant 0 : index
    %0 = vector.load %arg1[%c0, %c0_0] : memref<32x32xf32, #tpu.memory_space<vmem>>, vector<32x32xf32>
    %c0_1 = arith.constant 0 : index
    %c0_2 = arith.constant 0 : index
    %1 = vector.load %arg2[%c0_1, %c0_2] : memref<32x256xf32, #tpu.memory_space<vmem>>, vector<32x256xf32>
    %cst = arith.constant dense<0.000000e+00> : vector<32x256xf32>
    %2 = tpu.matmul %0, %1, %cst {dimension_numbers = #tpu.dot_dimension_numbers<[1], [0], [0], [1], [0, 0, 1, 1], [], []>, precision = #tpu.contract_precision<fp32>} : vector<32x32xf32>, vector<32x256xf32>, vector<32x256xf32> -> vector<32x256xf32>
    %c0_3 = arith.constant 0 : index
    %c0_4 = arith.constant 0 : index
    %3 = vector.load %arg3[%c0_3, %c0_4] : memref<1x256xf32, #tpu.memory_space<vmem>>, vector<1x256xf32>
    %4 = vector.broadcast %3 : vector<1x256xf32> to vector<32x256xf32>
    %5 = arith.addf %2, %4 : vector<32x256xf32>
    %cst_5 = arith.constant 0.000000e+00 : f32
    %6 = vector.broadcast %cst_5 : f32 to vector<32x256xf32>
    %7 = arith.cmpf ogt, %5, %6 : vector<32x256xf32>
    %cst_6 = arith.constant 0.00999999977 : f32
    %8 = vector.broadcast %cst_6 : f32 to vector<32x256xf32>
    %9 = arith.mulf %8, %5 : vector<32x256xf32>
    %10 = arith.select %7, %5, %9 : vector<32x256xi1>, vector<32x256xf32>
    %c0_7 = arith.constant 0 : index
    %c0_8 = arith.constant 0 : index
    %11 = vector.load %arg4[%c0_7, %c0_8] : memref<256x10xf32, #tpu.memory_space<vmem>>, vector<256x10xf32>
    %cst_9 = arith.constant dense<0.000000e+00> : vector<32x10xf32>
    %12 = tpu.matmul %10, %11, %cst_9 {dimension_numbers = #tpu.dot_dimension_numbers<[1], [0], [0], [1], [0, 0, 1, 1], [], []>, precision = #tpu.contract_precision<fp32>} : vector<32x256xf32>, vector<256x10xf32>, vector<32x10xf32> -> vector<32x10xf32>
    %c0_10 = arith.constant 0 : index
    %c0_11 = arith.constant 0 : index
    %13 = vector.load %arg5[%c0_10, %c0_11] : memref<1x10xf32, #tpu.memory_space<vmem>>, vector<1x10xf32>
    %14 = vector.broadcast %13 : vector<1x10xf32> to vector<32x10xf32>
    %15 = arith.addf %12, %14 : vector<32x10xf32>
    %c0_12 = arith.constant 0 : index
    %c0_13 = arith.constant 0 : index
    %16 = vector.load %arg6[%c0_12, %c0_13] : memref<32x10xf32, #tpu.memory_space<vmem>>, vector<32x10xf32>
    tpu.vector_store %arg6[%c0_12, %c0_13], %15 {strides = array<i32>} : memref<32x10xf32, #tpu.memory_space<vmem>>, vector<32x10xf32>,
    return
  }
  func.func @transform_0(%arg0: i32) -> (i32, i32) {
    %c0_i32 = arith.constant 0 : i32
    %c0_i32_0 = arith.constant 0 : i32
    return %arg0, %c0_i32 : i32, i32
  }
  func.func @transform_1(%arg0: i32) -> (i32, i32) {
    %c0_i32 = arith.constant 0 : i32
    %c0_i32_0 = arith.constant 0 : i32
    %c0_i32_1 = arith.constant 0 : i32
    return %c0_i32, %c0_i32_0 : i32, i32
  }
  func.func @transform_2(%arg0: i32) -> (i32, i32) {
    %c0_i32 = arith.constant 0 : i32
    %c0_i32_0 = arith.constant 0 : i32
    %c0_i32_1 = arith.constant 0 : i32
    return %c0_i32, %c0_i32_0 : i32, i32
  }
  func.func @transform_3(%arg0: i32) -> (i32, i32) {
    %c0_i32 = arith.constant 0 : i32
    %c0_i32_0 = arith.constant 0 : i32
    %c0_i32_1 = arith.constant 0 : i32
    return %c0_i32, %c0_i32_0 : i32, i32
  }
  func.func @transform_4(%arg0: i32) -> (i32, i32) {
    %c0_i32 = arith.constant 0 : i32
    %c0_i32_0 = arith.constant 0 : i32
    %c0_i32_1 = arith.constant 0 : i32
    return %c0_i32, %c0_i32_0 : i32, i32
  }
  func.func @transform_5(%arg0: i32) -> (i32, i32) {
    %c0_i32 = arith.constant 0 : i32
    %c0_i32_0 = arith.constant 0 : i32
    return %arg0, %c0_i32 : i32, i32
  }
}

</mosaic_0001>

<bundles_post_ra>
// kernel: mlp_classifier_forward.1
= control target key start
LH: loop header
LB: loop body
LE: loop exit
PB: predicated region body
PF: predicated region fallthrough
CT: control target
= control target key end

     0   :  { %s2721_s18 = smov 0   ;;  %s3678_s0 = inlined_call_operand.vmem [shape: f32[64,32], index: 0, kind: input, shape index: {}]   ;;  %s3679_s1 = inlined_call_operand.vmem [shape: f32[32,256], index: 1, kind: input, shape index: {}]   ;;  %s3680_s2 = inlined_call_operand.vmem [shape: f32[1,256], index: 2, kind: input, shape index: {}]   ;;  %s3681_s3 = inlined_call_operand.vmem [shape: f32[256,10], index: 3, kind: input, shape index: {}]   ;;  %s3682_s4 = inlined_call_operand.vmem [shape: f32[1,10], index: 4, kind: input, shape index: {}]   ;;  %s3683_s5 = inlined_call_operand.vmem [shape: f32[64,10], index: 5, kind: output, shape index: {}]  }
   0x1 LB: > { %s2109_s19 = sadd.s32 4294967295, %s2688_s18   ;;  %p2113_p0 = scmp.ge.s32.totalorder %s2688_s18, 1  ;;  %s2688_s18 = sphi %s2721_s18, %s15_s18  }
   0x2   : > { %p188_p1 = scmp.lt.s32.totalorder %s2688_s18, 3 }
   0x4   : > { %p189_p2 = pnand %p2113_p0, %p188_p1 }
   0x6   : > { %192 = sbr.rel (%p189_p2) target bundleno = 656 (0x290), region = 40 }
   0xd   : > { %v2732_v0 = vld [vmem:[%s3679_s1 + $0x8] sm:$0xff]  ;;  %v2737_v1 = vld [vmem:[%s3679_s1 + $0x18] sm:$0xff]  ;;  %v2742_v2 = vld [vmem:[%s3679_s1] sm:$0xff]  ;;  %s2114_s26 = sshll.u32 %s2109_s19, 2  ;;  %vm252_vm0 = vcmask 261120   ;;  %v2690_v9 = vmov 0.0  }
   0xe   : > { %v265_v3 = vand.u32 4294901760, %v2732_v0  ;;  %v269_v4 = vand.u32 4294901760, %v2737_v1  ;;  %v2749_v5 = vld [vmem:[%s3679_s1 + $0x10] sm:$0xff]  ;;  %v267_v6 = vand.u32 4294901760, %v2742_v2  ;;  %v2755_v7 = vld [vmem:[%s3679_s1 + $0x28] sm:$0xff]  ;;  %v2760_v8 = vld [vmem:[%s3679_s1 + $0x38] sm:$0xff]  ;;  %486 = vmatprep.mubr.f32.mxu0 %v2690_v9  ;;  %337 = vmatprep.mubr.f32.mxu1 %v2690_v9 }
   0xf   : > { %v271_v10 = vand.u32 4294901760, %v2749_v5  ;;  %v273_v11 = vand.u32 4294901760, %v2755_v7  ;;  %v277_v12 = vand.u32 4294901760, %v2760_v8  ;;  %v2770_v13 = vld [vmem:[%s3679_s1 + $0x20] sm:$0xff]  ;;  %v2775_v14 = vld [vmem:[%s3679_s1 + $0x30] sm:$0xff]  ;;  %p217_p3 = scmp.lt.s32.totalorder %s2114_s26, 7 }
  0x10   : > { %v2780_v15 = vsub.f32 %v2732_v0, %v265_v3  ;;  %v2785_v16 = vsub.f32 %v2737_v1, %v269_v4  ;;  %v2790_v17 = vsub.f32 %v2742_v2, %v267_v6  ;;  %v275_v18 = vand.u32 4294901760, %v2770_v13  ;;  %v996_v0 = vld [vmem:[%s3681_s3 + $0x88] sm:$0xff] }
  0x11   : > { %v2796_v19 = vsub.f32 %v2749_v5, %v271_v10  ;;  %v2801_v20 = vsub.f32 %v2755_v7, %v273_v11  ;;  %v2806_v21 = vsub.f32 %v2760_v8, %v277_v12  ;;  %v279_v22 = vand.u32 4294901760, %v2775_v14  ;;  %s3884_s26 = smov (!%p217_p3, %s2114_s26), 7  ;;  %v979_v7 = vld [vmem:[%s3681_s3] sm:$0xff] }
  0x12   : > { %v3695_v23 = vand.u32 4294901760, %v2780_v15  ;;  %v3693_v24 = vand.u32 4294901760, %v2785_v16  ;;  %v3692_v25 = vand.u32 4294901760, %v2790_v17  ;;  %v2817_v26 = vsub.f32 %v2770_v13, %v275_v18  ;;  %s2115_s12 = sshll.u32 %s3884_s26, 3  ;;  %v2947_v13 = vld [vmem:[%s3681_s3 + $0x10] sm:$0xff] }
  0x13   : > { %v3691_v27 = vand.u32 4294901760, %v2796_v19  ;;  %v3690_v28 = vand.u32 4294901760, %v2801_v20  ;;  %v3689_v29 = vand.u32 4294901760, %v2806_v21  ;;  %v2825_v30 = vsub.f32 %v2775_v14, %v279_v22  ;;  %s220_s15 = scalar_lea.vmem %s3678_s0, %s2115_s12  ;;  %s226_s21 = scalar_lea.vmem %s3683_s5, %s2115_s12 }
  0x14   : > { %v385_v31 = vsub.f32 %v2780_v15, %v3695_v23  ;;  %v397_v32 = vsub.f32 %v2785_v16, %v3693_v24  ;;  %v391_v33 = vsub.f32 %v2790_v17, %v3692_v25  ;;  %v3687_v34 = vand.u32 4294901760, %v2817_v26  ;;  %v228_v39 = vld [vmem:[%s220_s15] sm:$0xff]  ;;  %v229_v48 = vld [vmem:[%s220_s15 + $0x8] sm:$0xff]  ;;  %v230_v49 = vld [vmem:[%s220_s15 + $0x10] sm:$0xff] }
  0x15   : > { %v403_v35 = vsub.f32 %v2796_v19, %v3691_v27  ;;  %v409_v36 = vsub.f32 %v2801_v20, %v3690_v28  ;;  %v421_v37 = vsub.f32 %v2806_v21, %v3689_v29  ;;  %v3686_v38 = vand.u32 4294901760, %v2825_v30  ;;  %v231_v61 = vld [vmem:[%s220_s15 + $0x18] sm:$0xff] }
  0x16   : > { %v386_v40 = vand.u32 4294901760, %v385_v31  ;;  %v398_v41 = vand.u32 4294901760, %v397_v32  ;;  %v392_v42 = vand.u32 4294901760, %v391_v33  ;;  %v415_v43 = vsub.f32 %v2817_v26, %v3687_v34 }
  0x17   : > { %v404_v44 = vand.u32 4294901760, %v403_v35  ;;  %v410_v45 = vand.u32 4294901760, %v409_v36  ;;  %v422_v46 = vand.u32 4294901760, %v421_v37  ;;  %v427_v47 = vsub.f32 %v2825_v30, %v3686_v38  ;;  %v995_v36 = vld [vmem:[%s3681_s3 + $0x80] sm:$0xff] }
  0x18   : > { %v2393_v50 = vpack.c.bf16 %v398_v41, %v386_v40  ;;  %v416_v51 = vand.u32 4294901760, %v415_v43  ;;  %v254_v52 = vsel %vm252_vm0, %v228_v39, 0  ;;  %v257_v57 = vsel %vm252_vm0, %v229_v48, 0  ;;  %v980_v39 = vld [vmem:[%s3681_s3 + $0x8] sm:$0xff] }
  0x19   : > { %v2395_v53 = vpack.c.bf16 %v404_v44, %v392_v42  ;;  %v2397_v54 = vpack.c.bf16 %v422_v46, %v410_v45  ;;  %v428_v55 = vand.u32 4294901760, %v427_v47  ;;  %v2860_v56 = vand.u32 4294901760, %v254_v52  ;;  %v997_v44 = vld [vmem:[%s3681_s3 + $0x90] sm:$0xff]  ;;  %v998_v45 = vld [vmem:[%s3681_s3 + $0x98] sm:$0xff] }
  0x1a   : > { %2394 = vmatprep.subr.bf16.mxu0 %v2393_v50  ;;  %v260_v58 = vsel %vm252_vm0, %v230_v49, 0  ;;  %v2864_v60 = vand.u32 4294901760, %v257_v57  ;;  %v2401_v63 = vpack.c.bf16 %v2785_v16, %v2780_v15  ;;  %v2877_v32 = vpack.c.bf16 %v269_v4, %v265_v3  ;;  %v982_v47 = vld [vmem:[%s3681_s3 + $0x18] sm:$0xff] }
  0x1b   : > { %2396 = vmatpush1.bf16.msra.mxu0 %v2395_v53  ;;  %v2399_v59 = vpack.c.bf16 %v428_v55, %v416_v51  ;;  %v2867_v62 = vsub.f32 %v254_v52, %v2860_v56  ;;  %v2871_v31 = vand.u32 4294901760, %v260_v58  ;;  %v2883_v33 = vpack.c.bf16 %v271_v10, %v267_v6 }
  0x1c   : > { %2398 = vmatprep.subr.bf16.mxu0 %v2397_v54  ;;  %v2886_v35 = vsub.f32 %v257_v57, %v2864_v60  ;;  %v263_v1 = vsel %vm252_vm0, %v231_v61, 0  ;;  %v2902_v2 = vpack.c.bf16 %v277_v12, %v273_v11  ;;  %2386 = vmatprep.subr.bf16.mxu1 %v2877_v32  ;;  %v2403_v5 = vpack.c.bf16 %v2796_v19, %v2790_v17  ;;  %v999_v57 = vld [vmem:[%s3681_s3 + $0xa0] sm:$0xff] }
  0x1d   : > { %v2896_v3 = vsub.f32 %v260_v58, %v2871_v31  ;;  %v3688_v4 = vand.u32 4294901760, %v2867_v62  ;;  %v2405_v6 = vpack.c.bf16 %v2806_v21, %v2801_v20  ;;  %2388 = vmatpush1.bf16.msra.mxu1 %v2883_v33  ;;  %v1067_v12 = vand.u32 4294901760, %v995_v36  ;;  %v1000_v58 = vld [vmem:[%s3681_s3 + $0xa8] sm:$0xff] }
  0x1e   : > { %v3685_v10 = vand.u32 4294901760, %v2886_v35  ;;  %2390 = vmatprep.subr.bf16.mxu1 %v2902_v2  ;;  %v1070_v37 = vand.u32 4294901760, %v996_v0  ;;  %v2407_v40 = vpack.c.bf16 %v2825_v30, %v2817_v26  ;;  %v2925_v41 = vand.u32 4294901760, %v263_v1 }
  0x1f   : > { %2400 = vmatpush1.bf16.msra.mxu0 %v2399_v59  ;;  %v3684_v8 = vand.u32 4294901760, %v2896_v3  ;;  %v341_v11 = vsub.f32 %v2867_v62, %v3688_v4  ;;  %v2931_v42 = vpack.c.bf16 %v279_v22, %v275_v18  ;;  %v2955_v18 = vsub.f32 %v995_v36, %v1067_v12  ;;  %v1003_v4 = vld [vmem:[%s3681_s3 + $0xc0] sm:$0xff] }
  0x20   : > { %2402 = vmatprep.subr.bf16.mxu0 %v2401_v63  ;;  %v2936_v43 = vsub.f32 %v2886_v35, %v3685_v10  ;;  %v2957_v22 = vsub.f32 %v996_v0, %v1070_v37  ;;  %v1019_v46 = vand.u32 4294901760, %v979_v7  ;;  %v2964_v48 = vsub.f32 %v263_v1, %v2925_v41  ;;  %v983_v0 = vld [vmem:[%s3681_s3 + $0x20] sm:$0xff]  ;;  %v984_v1 = vld [vmem:[%s3681_s3 + $0x28] sm:$0xff] }
  0x21   : > { %v2953_v14 = vsub.f32 %v2896_v3, %v3684_v8  ;;  %v342_v49 = vand.u32 4294901760, %v341_v11  ;;  %v2966_v50 = vpack.c.bf16 %v1070_v37, %v1067_v12  ;;  %v1022_v51 = vand.u32 4294901760, %v980_v39  ;;  %2392 = vmatpush1.bf16.msra.mxu1 %v2931_v42  ;;  %v1002_v37 = vld [vmem:[%s3681_s3 + $0xb8] sm:$0xff] }
  0x22   : > { %488 = vmatmul.mubr.f32.vlgmr.msra.gmra.mrb[0].mxu0 %v2860_v56  ;;  %v2969_v52 = vsub.f32 %v979_v7, %v1019_v46  ;;  %v1073_v53 = vand.u32 4294901760, %v997_v44  ;;  %v1076_v54 = vand.u32 4294901760, %v998_v45  ;;  %v1025_v55 = vand.u32 4294901760, %v2947_v13 }
  0x23   : > { %2404 = vmatpush1.bf16.msra.mxu0 %v2403_v5  ;;  %493 = vmatprep.mubr.f32.mxu0 %v2690_v9  ;;  %v3694_v59 = vand.u32 4294901760, %v2964_v48  ;;  %v353_v61 = vand.u32 4294901760, %v2936_v43  ;;  %v2980_v63 = vsub.f32 %v980_v39, %v1022_v51  ;;  %v1028_v36 = vand.u32 4294901760, %v982_v47  ;;  %v1001_v5 = vld [vmem:[%s3681_s3 + $0xb0] sm:$0xff] }
  0x24   : > { %2406 = vmatprep.subr.bf16.mxu0 %v2405_v6  ;;  %2434 = vmatprep.subr.bf16.mxu1 %v2966_v50  ;;  %v364_v6 = vand.u32 4294901760, %v2953_v14  ;;  %v2994_v7 = vsub.f32 %v997_v44, %v1073_v53  ;;  %v2996_v11 = vsub.f32 %v998_v45, %v1076_v54  ;;  %v2999_v12 = vsub.f32 %v2947_v13, %v1025_v55  ;;  %v985_v39 = vld [vmem:[%s3681_s3 + $0x30] sm:$0xff]  ;;  %v986_v13 = vld [vmem:[%s3681_s3 + $0x38] sm:$0xff] }
  0x25   : > { %v3008_v43 = vpack.c.bf16 %v1022_v51, %v1019_v46  ;;  %v3010_v44 = vsub.f32 %v982_v47, %v1028_v36  ;;  %v1079_v45 = vand.u32 4294901760, %v999_v57  ;;  %v1082_v14 = vand.u32 4294901760, %v1000_v58  ;;  %343 = vmatmul.mubr.f32.vlgmr.msra.gmra.mrb[0].mxu1 %v342_v49  ;;  %v1004_v49 = vld [vmem:[%s3681_s3 + $0xc8] sm:$0xff] }
  0x26   : > { %495 = vmatmul.mubr.f32.gmra.mrb[2].mxu0 %v2864_v60  ;;  %v3016_v8 = vpack.c.bf16 %v1076_v54, %v1073_v53  ;;  %v1031_v10 = vand.u32 4294901760, %v983_v0  ;;  %v1034_v38 = vand.u32 4294901760, %v984_v1  ;;  %v1085_v34 = vand.u32 4294901760, %v1001_v5  ;;  %348 = vmatprep.mubr.f32.mxu1 %v2690_v9 }
  0x27   : > { %500 = vmatprep.mubr.f32.mxu0 %v2690_v9  ;;  %2408 = vmatpush1.bf16.msra.mxu0 %v2407_v40  ;;  %v3020_v40 = vsub.f32 %v999_v57, %v1079_v45  ;;  %v3022_v46 = vsub.f32 %v1000_v58, %v1082_v14  ;;  %v1088_v47 = vand.u32 4294901760, %v1002_v37  ;;  %v1037_v51 = vand.u32 4294901760, %v985_v39 }
  0x28   : > { %2410 = vmatprep.subr.bf16.mxu0 %v2877_v32  ;;  %2436 = vmatpush3.bf16.msra.mxu1 %v3008_v43  ;;  %v374_v53 = vsub.f32 %v2964_v48, %v3694_v59  ;;  %v3035_v54 = vsub.f32 %v983_v0, %v1031_v10  ;;  %v3037_v57 = vsub.f32 %v984_v1, %v1034_v38  ;;  %v1040_v58 = vand.u32 4294901760, %v986_v13 }
  0x29   : > { %2438 = vmatprep.subr.bf16.mxu1 %v3016_v8  ;;  %v3040_v29 = vpack.c.bf16 %v1028_v36, %v1025_v55  ;;  %v3042_v28 = vsub.f32 %v1001_v5, %v1085_v34  ;;  %v3044_v27 = vsub.f32 %v1002_v37, %v1088_v47  ;;  %v3046_v25 = vsub.f32 %v985_v39, %v1037_v51 }
  0x2a   : > { %502 = vmatmul.mubr.f32.gmra.mrb[4].mxu0 %v2871_v31  ;;  %354 = vmatmul.mubr.f32.gmra.mrb[2].mxu1 %v353_v61  ;;  %v3048_v24 = vpack.c.bf16 %v1082_v14, %v1079_v45  ;;  %v3050_v59 = vsub.f32 %v986_v13, %v1040_v58  ;;  %v1091_v0 = vand.u32 4294901760, %v1003_v4  ;;  %v1094_v23 = vand.u32 4294901760, %v1004_v49 }
  0x2b   : > { %507 = vmatprep.mubr.f32.mxu0 %v2690_v9  ;;  %359 = vmatprep.mubr.f32.mxu1 %v2690_v9  ;;  %v3061_v61 = vpack.c.bf16 %v1034_v38, %v1031_v10  ;;  %v375_v1 = vand.u32 4294901760, %v374_v53  ;;  %v3063_v5 = vpack.c.bf16 %v1088_v47, %v1085_v34  ;;  %v3773_v38 = vand.u32 4294901760, %v2780_v15  ;;  %v1007_v53 = vld [vmem:[%s3681_s3 + $0xe0] sm:$0xff] }
  0x2c   : > { %2440 = vmatpush3.bf16.msra.mxu1 %v3040_v29  ;;  %v3056_v55 = vsub.f32 %v1003_v4, %v1091_v0  ;;  %v3058_v36 = vsub.f32 %v1004_v49, %v1094_v23  ;;  %v3071_v4 = vpack.c.bf16 %v1040_v58, %v1037_v51  ;;  %v3774_v34 = vand.u32 4294901760, %v2785_v16  ;;  %v1008_v58 = vld [vmem:[%s3681_s3 + $0xe8] sm:$0xff] }
  0x2d   : > { %2442 = vmatprep.subr.bf16.mxu1 %v3048_v24  ;;  %3770 = vst [vmem:[#allocation3_spill] sm:$0xff] %v3061_v61  ;;  %3771 = vst [vmem:[#allocation4_spill] sm:$0xff] %v3063_v5  ;;  %v3776_v15 = vand.u32 4294901760, %v2790_v17  ;;  %v3777_v16 = vand.u32 4294901760, %v2796_v19  ;;  %v3778_v37 = vand.u32 4294901760, %v2801_v20  ;;  %v3779_v39 = vand.u32 4294901760, %v2806_v21 }
  0x2e   : > { %509 = vmatmul.mubr.f32.gmra.mrb[6].mxu0 %v2925_v41  ;;  %3769 = vst [vmem:[#allocation2_spill] sm:$0xff] %v3056_v55  ;;  %365 = vmatmul.mubr.f32.gmra.mrb[4].mxu1 %v364_v6  ;;  %3772 = vst [vmem:[#allocation5_spill] sm:$0xff] %v3071_v4  ;;  %v2417_v10 = vpack.c.bf16 %v3774_v34, %v3773_v38  ;;  %v3078_v6 = vpack.c.bf16 %v1094_v23, %v1091_v0  ;;  %v3780_v14 = vand.u32 4294901760, %v2867_v62  ;;  %v987_v21 = vld [vmem:[%s3681_s3 + $0x40] sm:$0xff]  ;;  %v992_v34 = vld [vmem:[%s3681_s3 + $0x68] sm:$0xff]  ;;  %vm2048_vm9 = vcmask 80896  }
  0x2f   : > { %595 = vmatprep.mubr.f32.mxu0 %v2690_v9  ;;  %370 = vmatprep.mubr.f32.mxu1 %v2690_v9  ;;  %v2419_v23 = vpack.c.bf16 %v3777_v16, %v3776_v15  ;;  %v2421_v45 = vpack.c.bf16 %v3779_v39, %v3778_v37  ;;  %v3781_v13 = vand.u32 4294901760, %v2817_v26  ;;  %v3782_v47 = vand.u32 4294901760, %v2825_v30  ;;  %v988_v26 = vld [vmem:[%s3681_s3 + $0x48] sm:$0xff]  ;;  %v991_v38 = vld [vmem:[%s3681_s3 + $0x60] sm:$0xff]  ;;  %v1009_v37 = vld [vmem:[%s3681_s3 + $0xf0] sm:$0xff] }
  0x30   : > { %2444 = vmatpush3.bf16.msra.mxu1 %v3061_v61  ;;  %3775 = vst [vmem:[#allocation6_spill] sm:$0xff] %v3078_v6  ;;  %v3783_v17 = vand.u32 4294901760, %v2886_v35  ;;  %v3784_v19 = vand.u32 4294901760, %v2896_v3  ;;  %v3785_v20 = vand.u32 4294901760, %v2964_v48  ;;  %v1043_v30 = vand.u32 4294901760, %v987_v21  ;;  %v1010_v39 = vld [vmem:[%s3681_s3 + $0xf8] sm:$0xff] }
  0x31   : > { %2446 = vmatprep.subr.bf16.mxu1 %v3063_v5  ;;  %v2423_v51 = vpack.c.bf16 %v3782_v47, %v3781_v13  ;;  %v1103_v0 = vand.u32 4294901760, %v1007_v53  ;;  %v1058_v15 = vand.u32 4294901760, %v992_v34  ;;  %v993_v13 = vld [vmem:[%s3681_s3 + $0x70] sm:$0xff]  ;;  %v994_v47 = vld [vmem:[%s3681_s3 + $0x78] sm:$0xff] }
  0x32   : > { %598 = vmatmul.mubr.f32.vlgmr.msra.gmra.mrb[0].mxu0 %v2867_v62  ;;  %376 = vmatmul.mubr.f32.gmra.mrb[6].mxu1 %v375_v1  ;;  %v1106_v1 = vand.u32 4294901760, %v1008_v58 }
  0x33   : > { %2412 = vmatpush1.bf16.msra.mxu0 %v2883_v33  ;;  %603 = vmatprep.mubr.f32.mxu0 %v2690_v9 }
  0x34   : > { %2414 = vmatprep.subr.bf16.mxu0 %v2902_v2  ;;  %2448 = vmatpush3.bf16.msra.mxu1 %v3071_v4  ;;  %v3187_v16 = vpack.c.bf16 %v1106_v1, %v1103_v0 }
  0x35   : > { %2450 = vmatprep.subr.bf16.mxu1 %v3078_v6 }
  0x36   : > { %606 = vmatmul.mubr.f32.gmra.mrb[2].mxu0 %v2886_v35  ;;  %3791 = vst [vmem:[#allocation12_spill] sm:$0xff] %v3187_v16 }
  0x37   : > { %611 = vmatprep.mubr.f32.mxu0 %v2690_v9  ;;  %2416 = vmatpush1.bf16.msra.mxu0 %v2931_v42 }
  0x38   : > { %2418 = vmatprep.subr.bf16.mxu0 %v2417_v10  ;;  %v1055_v10 = vand.u32 4294901760, %v991_v38 }
  0x3a   : > { %614 = vmatmul.mubr.f32.gmra.mrb[4].mxu0 %v2896_v3  ;;  %v989_v3 = vld [vmem:[%s3681_s3 + $0x50] sm:$0xff] }
  0x3b   : > { %619 = vmatprep.mubr.f32.mxu0 %v2690_v9 }
  0x3e   : > { %622 = vmatmul.mubr.f32.gmra.mrb[6].mxu0 %v2964_v48 }
  0x3f   : > { %700 = vmatprep.mubr.f32.mxu0 %v2690_v9 }
  0x42   : > { %704 = vmatmul.mubr.f32.vlgmr.msra.gmra.mrb[0].mxu0 %v3780_v14  ;;  %v1112_v14 = vand.u32 4294901760, %v1010_v39 }
  0x43   : > { %2420 = vmatpush1.bf16.msra.mxu0 %v2419_v23  ;;  %709 = vmatprep.mubr.f32.mxu0 %v2690_v9  ;;  %v3189_v23 = vpack.c.bf16 %v1058_v15, %v1055_v10 }
  0x44   : > { %2422 = vmatprep.subr.bf16.mxu0 %v2421_v45  ;;  %v1109_v45 = vand.u32 4294901760, %v1009_v37 }
  0x45   : > { %3792 = vst [vmem:[#allocation13_spill] sm:$0xff] %v3189_v23 }
  0x46   : > { %713 = vmatmul.mubr.f32.gmra.mrb[2].mxu0 %v3783_v17  ;;  %v1064_v17 = vand.u32 4294901760, %v994_v47 }
  0x47   : > { %718 = vmatprep.mubr.f32.mxu0 %v2690_v9  ;;  %2424 = vmatpush1.bf16.msra.mxu0 %v2423_v51  ;;  %v1061_v51 = vand.u32 4294901760, %v993_v13 }
  0x48   : > { %2426 = vmatprep.subr.bf16.mxu0 %v2877_v32  ;;  %v1006_v32 = vld [vmem:[%s3681_s3 + $0xd8] sm:$0xff] }
  0x49   : > { %v1100_v35 = vand.u32 4294901760, %v1006_v32 }
  0x4a   : > { %722 = vmatmul.mubr.f32.gmra.mrb[4].mxu0 %v3784_v19  ;;  %v3207_v19 = vpack.c.bf16 %v1112_v14, %v1109_v45 }
  0x4b   : > { %727 = vmatprep.mubr.f32.mxu0 %v2690_v9 }
  0x4c   : > { %3793 = vst [vmem:[#allocation14_spill] sm:$0xff] %v3207_v19 }
  0x4e   : > { %731 = vmatmul.mubr.f32.gmra.mrb[6].mxu0 %v3785_v20  ;;  %v3209_v20 = vpack.c.bf16 %v1064_v17, %v1061_v51 }
  0x4f   : > { %825 = vmatprep.mubr.f32.mxu0 %v2690_v9 }
  0x50   : > { %3794 = vst [vmem:[#allocation15_spill] sm:$0xff] %v3209_v20 }
  0x52   : > { %827 = vmatmul.mubr.f32.vlgmr.msra.gmra.mrb[0].mxu0 %v2860_v56 }
  0x53   : > { %2428 = vmatpush1.bf16.msra.mxu0 %v2883_v33  ;;  %832 = vmatprep.mubr.f32.mxu0 %v2690_v9 }
  0x54   : > { %2430 = vmatprep.subr.bf16.mxu0 %v2902_v2  ;;  %v990_v2 = vld [vmem:[%s3681_s3 + $0x58] sm:$0xff] }
  0x56   : > { %834 = vmatmul.mubr.f32.gmra.mrb[2].mxu0 %v2864_v60 }
  0x57   : > { %839 = vmatprep.mubr.f32.mxu0 %v2690_v9  ;;  %2432 = vmatpush1.bf16.msra.mxu0 %v2931_v42  ;;  %v1052_v42 = vand.u32 4294901760, %v990_v2 }
  0x58   : > { %2530 = vmatprep.subr.bf16.mxu0 %v2966_v50 }
  0x5a   : > { %841 = vmatmul.mubr.f32.gmra.mrb[4].mxu0 %v2871_v31 }
  0x5b   : > { %846 = vmatprep.mubr.f32.mxu0 %v2690_v9 }
  0x5e   : > { %848 = vmatmul.mubr.f32.gmra.mrb[6].mxu0 %v2925_v41 }
  0x5f   : > { %926 = vmatprep.mubr.f32.mxu0 %v2690_v9 }
  0x62   : > { %928 = vmatmul.mubr.f32.vlgmr.msra.gmra.mrb[0].mxu0 %v2860_v56 }
  0x63   : > { %933 = vmatprep.mubr.f32.mxu0 %v2690_v9  ;;  %2532 = vmatpush3.bf16.msra.mxu0 %v3008_v43 }
  0x64   : > { %2534 = vmatprep.subr.bf16.mxu0 %v3016_v8 }
  0x66   : > { %935 = vmatmul.mubr.f32.gmra.mrb[2].mxu0 %v2864_v60  ;;  %v3149_v60 = vsub.f32 %v987_v21, %v1043_v30  ;;  %v3703_v21 = vand.u32 4294901760, %v2955_v18 }
  0x67   : > { %940 = vmatprep.mubr.f32.mxu0 %v2690_v9  ;;  %2536 = vmatpush3.bf16.msra.mxu0 %v3040_v29 }
  0x68   : > { %2538 = vmatprep.subr.bf16.mxu0 %v3048_v24  ;;  %3787 = vst [vmem:[#allocation8_spill] sm:$0xff] %v3149_v60 }
  0x6a   : > { %942 = vmatmul.mubr.f32.gmra.mrb[4].mxu0 %v2871_v31  ;;  %v1005_v31 = vld [vmem:[%s3681_s3 + $0xd0] sm:$0xff] }
  0x6b   : > { %947 = vmatprep.mubr.f32.mxu0 %v2690_v9  ;;  %2540 = vmatpush3.bf16.msra.mxu0 %v3061_v61  ;;  %v1046_v9 = vand.u32 4294901760, %v988_v26  ;;  %v1097_v33 = vand.u32 4294901760, %v1005_v31 }
  0x6c   : > { %2542 = vmatprep.subr.bf16.mxu0 %v3063_v5 }
  0x6d   : > { %v3147_v56 = vpack.c.bf16 %v1046_v9, %v1043_v30  ;;  %v3151_v62 = vsub.f32 %v988_v26, %v1046_v9  ;;  %v3167_v48 = vpack.c.bf16 %v1100_v35, %v1097_v33  ;;  %v3705_v26 = vand.u32 4294901760, %v2957_v22 }
  0x6e   : > { %949 = vmatmul.mubr.f32.gmra.mrb[6].mxu0 %v2925_v41  ;;  %v1049_v41 = vand.u32 4294901760, %v989_v3  ;;  %v3707_v30 = vand.u32 4294901760, %v2969_v52  ;;  %v3710_v9 = vand.u32 4294901760, %v2980_v63 }
  0x6f   : > { %2544 = vmatpush3.bf16.msra.mxu0 %v3071_v4  ;;  %3786 = vst [vmem:[#allocation7_spill] sm:$0xff] %v3147_v56  ;;  %3788 = vst [vmem:[#allocation9_spill] sm:$0xff] %v3151_v62  ;;  %2452 = vmatpush3.bf16.msra.mxu1 %v3147_v56  ;;  %v3246_v4 = vsub.f32 %v992_v34, %v1058_v15  ;;  %v3715_v15 = vand.u32 4294901760, %v3037_v57 }
  0x70   : > { %2546 = vmatprep.subr.bf16.mxu0 %v3078_v6  ;;  %3789 = vst [vmem:[#allocation10_spill] sm:$0xff] %v3167_v48  ;;  %v3169_v49 = vpack.c.bf16 %v1052_v42, %v1049_v41  ;;  %2454 = vmatprep.subr.bf16.mxu1 %v3167_v48  ;;  %v3242_v6 = vsub.f32 %v1008_v58, %v1106_v1  ;;  %v3728_v58 = vand.u32 4294901760, %v3010_v44 }
  0x71   : > { %3802 = vst [vmem:[#allocation23_spill] sm:$0xff] %v3246_v4 }
  0x72   : > { %3790 = vst [vmem:[#allocation11_spill] sm:$0xff] %v3169_v49  ;;  %3800 = vst [vmem:[#allocation21_spill] sm:$0xff] %v3242_v6  ;;  %v1200_v34 = vsub.f32 %v3010_v44, %v3728_v58 }
  0x73   : > { %2548 = vmatpush3.bf16.msra.mxu0 %v3147_v56  ;;  %2456 = vmatpush3.bf16.msra.mxu1 %v3169_v49  ;;  %v3238_v56 = vsub.f32 %v990_v2, %v1052_v42  ;;  %v3734_v42 = vand.u32 4294901760, %v2996_v11 }
  0x74   : > { %2550 = vmatprep.subr.bf16.mxu0 %v3167_v48  ;;  %2458 = vmatprep.subr.bf16.mxu1 %v3187_v16  ;;  %v3236_v48 = vsub.f32 %v989_v3, %v1049_v41  ;;  %v3735_v41 = vand.u32 4294901760, %v2994_v7 }
  0x75   : > { %3798 = vst [vmem:[#allocation19_spill] sm:$0xff] %v3238_v56  ;;  %v1312_v1 = vsub.f32 %v2996_v11, %v3734_v42 }
  0x76   : > { %3797 = vst [vmem:[#allocation18_spill] sm:$0xff] %v3236_v48 }
  0x77   : > { %2552 = vmatpush3.bf16.msra.mxu0 %v3169_v49  ;;  %2460 = vmatpush3.bf16.msra.mxu1 %v3189_v23  ;;  %v3234_v49 = vsub.f32 %v1006_v32, %v1100_v35  ;;  %v3250_v32 = vsub.f32 %v1010_v39, %v1112_v14  ;;  %v3254_v35 = vsub.f32 %v994_v47, %v1064_v17 }
  0x78   : > { %2554 = vmatprep.subr.bf16.mxu0 %v3187_v16  ;;  %2462 = vmatprep.subr.bf16.mxu1 %v3207_v19  ;;  %v3232_v16 = vsub.f32 %v1005_v31, %v1097_v33  ;;  %v3248_v31 = vsub.f32 %v1009_v37, %v1109_v45  ;;  %v3252_v33 = vsub.f32 %v993_v13, %v1061_v51  ;;  %v1313_v37 = vand.u32 4294901760, %v1312_v1 }
  0x79   : > { %3796 = vst [vmem:[#allocation17_spill] sm:$0xff] %v3234_v49  ;;  %3804 = vst [vmem:[#allocation25_spill] sm:$0xff] %v3250_v32  ;;  %v1201_v13 = vand.u32 4294901760, %v1200_v34  ;;  %v1214_v51 = vsub.f32 %v3037_v57, %v3715_v15  ;;  %v3712_v34 = vand.u32 4294901760, %v3046_v25 }
  0x7a   : > { %3795 = vst [vmem:[#allocation16_spill] sm:$0xff] %v3232_v16  ;;  %3803 = vst [vmem:[#allocation24_spill] sm:$0xff] %v3248_v31  ;;  %v3721_v15 = vand.u32 4294901760, %v3232_v16 }
  0x7b   : > { %2556 = vmatpush3.bf16.msra.mxu0 %v3189_v23  ;;  %2464 = vmatpush3.bf16.msra.mxu1 %v3209_v20  ;;  %v1291_v23 = vsub.f32 %v2955_v18, %v3703_v21  ;;  %v3240_v21 = vsub.f32 %v1007_v53, %v1103_v0  ;;  %3805 = vst [vmem:[#allocation26_spill] sm:$0xff] %v3252_v33  ;;  %3806 = vst [vmem:[#allocation27_spill] sm:$0xff] %v3254_v35  ;;  %v3729_v53 = vand.u32 4294901760, %v2999_v12 }
  0x7c   : > { %2558 = vmatprep.subr.bf16.mxu0 %v3207_v19  ;;  %v1298_v19 = vsub.f32 %v2957_v22, %v3705_v26  ;;  %v3244_v26 = vsub.f32 %v991_v38, %v1055_v10  ;;  %v1305_v0 = vsub.f32 %v2994_v7, %v3735_v41  ;;  %v3717_v10 = vand.u32 4294901760, %v3035_v54 }
  0x7d   : > { %3799 = vst [vmem:[#allocation20_spill] sm:$0xff] %v3240_v21  ;;  %v1193_v38 = vsub.f32 %v2999_v12, %v3729_v53 }
  0x7e   : > { %3801 = vst [vmem:[#allocation22_spill] sm:$0xff] %v3244_v26  ;;  %v1299_v5 = vand.u32 4294901760, %v1298_v19  ;;  %v1207_v47 = vsub.f32 %v3035_v54, %v3717_v10 }
  0x7f   : > { %2560 = vmatpush3.bf16.msra.mxu0 %v3209_v20  ;;  %v1179_v20 = vsub.f32 %v2969_v52, %v3707_v30  ;;  %v1292_v30 = vand.u32 4294901760, %v1291_v23  ;;  %v1306_v23 = vand.u32 4294901760, %v1305_v0  ;;  %v1194_v14 = vand.u32 4294901760, %v1193_v38 }
  0x80   : > { %2594 = vmatprep.subr.bf16.mxu0 %v2966_v50  ;;  %v1186_v50 = vsub.f32 %v2980_v63, %v3710_v9  ;;  %v3711_v0 = vand.u32 4294901760, %v3044_v27 }
  0x81   : > { %v1180_v61 = vand.u32 4294901760, %v1179_v20  ;;  %v2465_v3 = vpack.c.bf16 %v1299_v5, %v1292_v30  ;;  %v3722_v5 = vand.u32 4294901760, %v3022_v46  ;;  %v3290_v17 = vpack.c.bf16 %v1313_v37, %v1306_v23 }
  0x82   : > { %v1187_v9 = vand.u32 4294901760, %v1186_v50  ;;  %v3714_v30 = vand.u32 4294901760, %v3042_v28  ;;  %v1208_v50 = vand.u32 4294901760, %v1207_v47  ;;  %v3713_v23 = vand.u32 4294901760, %v3050_v59 }
  0x83   : > { %2466 = vmatprep.subr.bf16.mxu1 %v2465_v3  ;;  %v1326_v45 = vsub.f32 %v3022_v46, %v3722_v5  ;;  %v1215_v3 = vand.u32 4294901760, %v1214_v51  ;;  %v3716_v47 = vand.u32 4294901760, %v3056_v55  ;;  %v3727_v5 = vand.u32 4294901760, %v3240_v21 }
  0x84   : > { %v3256_v2 = vpack.c.bf16 %v1187_v9, %v1180_v61  ;;  %v3723_v61 = vand.u32 4294901760, %v3020_v40  ;;  %v3293_v9 = vpack.c.bf16 %v1201_v13, %v1194_v14  ;;  %v1333_v38 = vsub.f32 %v3042_v28, %v3714_v30 }
  0x85   : > { %v1327_v20 = vand.u32 4294901760, %v1326_v45  ;;  %v3303_v37 = vpack.c.bf16 %v1215_v3, %v1208_v50  ;;  %v1221_v14 = vsub.f32 %v3046_v25, %v3712_v34  ;;  %v1228_v13 = vsub.f32 %v3050_v59, %v3713_v23 }
  0x86   : > { %v1319_v39 = vsub.f32 %v3020_v40, %v3723_v61  ;;  %v1334_v45 = vand.u32 4294901760, %v1333_v38  ;;  %v3720_v50 = vand.u32 4294901760, %v3151_v62  ;;  %v1347_v38 = vsub.f32 %v3056_v55, %v3716_v47 }
  0x87   : > { %v1222_v3 = vand.u32 4294901760, %v1221_v14 }
  0x88   : > { %v1320_v19 = vand.u32 4294901760, %v1319_v39  ;;  %v1340_v39 = vsub.f32 %v3044_v27, %v3711_v0  ;;  %v1229_v0 = vand.u32 4294901760, %v1228_v13  ;;  %v1242_v30 = vsub.f32 %v3151_v62, %v3720_v50 }
  0x89   : > { %v1348_v13 = vand.u32 4294901760, %v1347_v38 }
  0x8a   : > { %v3296_v1 = vpack.c.bf16 %v1327_v20, %v1320_v19  ;;  %v1341_v51 = vand.u32 4294901760, %v1340_v39  ;;  %v3718_v19 = vand.u32 4294901760, %v3058_v36  ;;  %v3719_v20 = vand.u32 4294901760, %v3149_v60 }
  0x8b   : > { %v3332_v14 = vpack.c.bf16 %v1229_v0, %v1222_v3  ;;  %v1243_v10 = vand.u32 4294901760, %v1242_v30  ;;  %v3725_v0 = vand.u32 4294901760, %v3238_v56 }
  0x8c   : > { %v3321_v34 = vpack.c.bf16 %v1341_v51, %v1334_v45  ;;  %v1354_v23 = vsub.f32 %v3058_v36, %v3718_v19  ;;  %v1235_v39 = vsub.f32 %v3149_v60, %v3719_v20  ;;  %v3724_v45 = vand.u32 4294901760, %v3234_v49 }
  0x8d   : > { %v3726_v19 = vand.u32 4294901760, %v3236_v48  ;;  %v1361_v20 = vsub.f32 %v3232_v16, %v3721_v15  ;;  %v1256_v15 = vsub.f32 %v3238_v56, %v3725_v0 }
  0x8e   : > { %v1355_v51 = vand.u32 4294901760, %v1354_v23  ;;  %v1236_v47 = vand.u32 4294901760, %v1235_v39  ;;  %v1368_v50 = vsub.f32 %v3234_v49, %v3724_v45  ;;  %v3730_v45 = vand.u32 4294901760, %v3242_v6 }
  0x8f   : > { %v1249_v30 = vsub.f32 %v3236_v48, %v3726_v19  ;;  %v1362_v23 = vand.u32 4294901760, %v1361_v20  ;;  %v1375_v20 = vsub.f32 %v3240_v21, %v3727_v5 }
  0x90   : > { %v3344_v3 = vpack.c.bf16 %v1355_v51, %v1348_v13  ;;  %v3346_v38 = vpack.c.bf16 %v1243_v10, %v1236_v47  ;;  %v1369_v39 = vand.u32 4294901760, %v1368_v50  ;;  %v3731_v13 = vand.u32 4294901760, %v3244_v26 }
  0x91   : > { %v1250_v61 = vand.u32 4294901760, %v1249_v30  ;;  %v3732_v10 = vand.u32 4294901760, %v3246_v4  ;;  %v1257_v51 = vand.u32 4294901760, %v1256_v15  ;;  %v1382_v50 = vsub.f32 %v3242_v6, %v3730_v45 }
  0x92   : > { %v3358_v47 = vpack.c.bf16 %v1369_v39, %v1362_v23  ;;  %v1263_v30 = vsub.f32 %v3244_v26, %v3731_v13  ;;  %v1376_v23 = vand.u32 4294901760, %v1375_v20  ;;  %v3733_v15 = vand.u32 4294901760, %v3248_v31 }
  0x93   : > { %v1270_v0 = vsub.f32 %v3246_v4, %v3732_v10  ;;  %v3372_v19 = vpack.c.bf16 %v1257_v51, %v1250_v61  ;;  %v3736_v39 = vand.u32 4294901760, %v3250_v32  ;;  %v1383_v5 = vand.u32 4294901760, %v1382_v50 }
  0x94   : > { %v1264_v58 = vand.u32 4294901760, %v1263_v30  ;;  %v3738_v45 = vand.u32 4294901760, %v3252_v33  ;;  %v1389_v13 = vsub.f32 %v3248_v31, %v3733_v15  ;;  %v3737_v61 = vand.u32 4294901760, %v3254_v35 }
  0x95   : > { %3807 = vst [vmem:[#allocation28_spill] sm:$0xff] %v3372_v19  ;;  %v1271_v53 = vand.u32 4294901760, %v1270_v0  ;;  %v1396_v10 = vsub.f32 %v3250_v32, %v3736_v39  ;;  %v3384_v51 = vpack.c.bf16 %v1383_v5, %v1376_v23 }
  0x96   : > { %v1277_v0 = vsub.f32 %v3252_v33, %v3738_v45  ;;  %v1390_v50 = vand.u32 4294901760, %v1389_v13  ;;  %v1284_v15 = vsub.f32 %v3254_v35, %v3737_v61 }
  0x97   : > { %v3386_v20 = vpack.c.bf16 %v1271_v53, %v1264_v58  ;;  %v1397_v30 = vand.u32 4294901760, %v1396_v10  ;;  %v242_v58 = vlaneseq }
  0x98   : > { %v1278_v42 = vand.u32 4294901760, %v1277_v0  ;;  %v1285_v39 = vand.u32 4294901760, %v1284_v15 }
  0x99   : > { %v3394_v41 = vpack.c.bf16 %v1397_v30, %v1390_v50  ;;  %v243_v53 = vshrl.u32 %v242_v58, 7 }
  0x9a   : > { %v3396_v19 = vpack.c.bf16 %v1285_v39, %v1278_v42  ;;  %v240_v42 = vld [vmem:[%s3680_s2] sm:$0x3] }
  0x9b   : > { %v244_v48 = vsub.s32 0, %v243_v53  ;;  %v248_v15 = vsub.s32 1, %v243_v53 }
  0x9d   : > { %v245_v26 = vrot.slane %v240_v42, %v244_v48  ;;  %v249_v4 = vrot.slane %v240_v42, %v248_v15 }
  0xf8   : > { %v344_v61 = vpop.f32.mrb[0].mxu1 }
  0xf9   : > { %v346_v45 = vpop.f32.mrb[1].mxu1  ;;  %v345_v21 = vadd.f32 %v344_v61, %v245_v26 }
  0xfa   : > { %v347_v6 = vadd.f32 %v346_v45, %v249_v4 }
  0xfd   : > { %v355_v23 = vpop.f32.mrb[2].mxu1 }
  0xfe   : > { %v357_v10 = vpop.f32.mrb[3].mxu1  ;;  %v356_v0 = vadd.f32 %v355_v23, %v245_v26 }
  0xff   : > { %v358_v35 = vadd.f32 %v357_v10, %v249_v4 }
 0x101   : > { %v366_v50 = vpop.f32.mrb[4].mxu1 }
 0x102   : > { %v368_v13 = vpop.f32.mrb[5].mxu1  ;;  %v367_v55 = vadd.f32 %v366_v50, %v245_v26 }
 0x103   : > { %v369_v45 = vadd.f32 %v368_v13, %v249_v4 }
 0x105   : > { %v377_v5 = vpop.f32.mrb[6].mxu1 }
 0x106   : > { %v379_v30 = vpop.f32.mrb[7].mxu1  ;;  %v378_v23 = vadd.f32 %v377_v5, %v245_v26 }
 0x135   : > { %v929_v39 = vpop.f32.mrb[0].mxu0 }
 0x136   : > { %v2626_v31 = vadd.f32 %v929_v39, %v345_v21  ;;  %v931_v32 = vpop.f32.mrb[1].mxu0 }
 0x137   : > { %v2628_v33 = vadd.f32 %v931_v32, %v347_v6 }
 0x138   : > { %vm955_vm1 = vcmp.gt.f32.partialorder %v2626_v31, 0.0  ;;  %v963_v56 = vmul.f32 0.01, %v2626_v31 }
 0x139   : > { %vm956_vm2 = vcmp.gt.f32.partialorder %v2628_v33, 0.0  ;;  %v964_v58 = vmul.f32 0.01, %v2628_v33  ;;  %v936_v16 = vpop.f32.mrb[2].mxu0 }
 0x13a   : > { %v971_v49 = vsel %vm955_vm1, %v2626_v31, %v963_v56  ;;  %v2630_v60 = vadd.f32 %v936_v16, %v356_v0  ;;  %v938_v62 = vpop.f32.mrb[3].mxu0 }
 0x13b   : > { %v3433_v53 = vand.u32 4294901760, %v971_v49  ;;  %v972_v48 = vsel %vm956_vm2, %v2628_v33, %v964_v58  ;;  %v2632_v61 = vadd.f32 %v938_v62, %v358_v35  ;;  %v380_v33 = vadd.f32 %v379_v30, %v249_v4 }
 0x13c   : > { %v3435_v42 = vand.u32 4294901760, %v972_v48  ;;  %vm957_vm3 = vcmp.gt.f32.partialorder %v2630_v60, 0.0  ;;  %v965_v21 = vmul.f32 0.01, %v2630_v60 }
 0x13d   : > { %v3438_v6 = vsub.f32 %v971_v49, %v3433_v53  ;;  %vm958_vm4 = vcmp.gt.f32.partialorder %v2632_v61, 0.0  ;;  %v966_v32 = vmul.f32 0.01, %v2632_v61  ;;  %v943_v10 = vpop.f32.mrb[4].mxu0 }
 0x13e   : > { %v3441_v56 = vsub.f32 %v972_v48, %v3435_v42  ;;  %v973_v16 = vsel %vm957_vm3, %v2630_v60, %v965_v21  ;;  %v2634_v31 = vadd.f32 %v943_v10, %v367_v55  ;;  %v945_v15 = vpop.f32.mrb[5].mxu0 }
 0x13f   : > { %v1122_v62 = vand.u32 4294901760, %v3438_v6  ;;  %v3444_v35 = vand.u32 4294901760, %v973_v16  ;;  %v974_v13 = vsel %vm958_vm4, %v2632_v61, %v966_v32  ;;  %v2636_v39 = vadd.f32 %v945_v15, %v369_v45 }
 0x140   : > { %v3446_v0 = vand.u32 4294901760, %v974_v13  ;;  %vm959_vm5 = vcmp.gt.f32.partialorder %v2634_v31, 0.0  ;;  %v967_v49 = vmul.f32 0.01, %v2634_v31  ;;  %v1116_v50 = vand.u32 4294901760, %v3441_v56 }
 0x141   : > { %v1123_v26 = vsub.f32 %v3438_v6, %v1122_v62  ;;  %v3451_v5 = vsub.f32 %v973_v16, %v3444_v35  ;;  %vm960_vm6 = vcmp.gt.f32.partialorder %v2636_v39, 0.0  ;;  %v968_v55 = vmul.f32 0.01, %v2636_v39  ;;  %v950_v4 = vpop.f32.mrb[6].mxu0 }
 0x142   : > { %v3454_v60 = vsub.f32 %v974_v13, %v3446_v0  ;;  %v975_v30 = vsel %vm959_vm5, %v2634_v31, %v967_v49  ;;  %v2638_v58 = vadd.f32 %v950_v4, %v378_v23  ;;  %v952_v48 = vpop.f32.mrb[7].mxu0  ;;  %1692 = vmatprep.mubr.f32.mxu0 %v1116_v50  ;;  %v1117_v61 = vsub.f32 %v3441_v56, %v1116_v50 }
 0x143   : > { %v1124_v45 = vand.u32 4294901760, %v1123_v26  ;;  %v3457_v21 = vand.u32 4294901760, %v975_v30  ;;  %v976_v32 = vsel %vm960_vm6, %v2636_v39, %v968_v55  ;;  %v2640_v10 = vadd.f32 %v952_v48, %v380_v33  ;;  %1696 = vmatmul.mubr.f32.vlgmr.msra.gmra.mrb[8].mxu0 %v1122_v62 }
 0x144   : > { %v3459_v16 = vand.u32 4294901760, %v976_v32  ;;  %vm961_vm7 = vcmp.gt.f32.partialorder %v2638_v58, 0.0  ;;  %v969_v15 = vmul.f32 0.01, %v2638_v58  ;;  %2596 = vmatpush3.bf16.msra.mxu0 %v3008_v43  ;;  %v1118_v13 = vand.u32 4294901760, %v1117_v61 }
 0x145   : > { %v3463_v31 = vsub.f32 %v975_v30, %v3457_v21  ;;  %vm962_vm8 = vcmp.gt.f32.partialorder %v2640_v10, 0.0  ;;  %v970_v23 = vmul.f32 0.01, %v2640_v10  ;;  %v1131_v49 = vand.u32 4294901760, %v3454_v60  ;;  %2598 = vmatprep.subr.bf16.mxu0 %v3016_v8 }
 0x146   : > { %v3468_v39 = vsub.f32 %v976_v32, %v3459_v16  ;;  %v977_v33 = vsel %vm961_vm7, %v2638_v58, %v969_v15  ;;  %1119 = vmatprep.mubr.f32.mxu1 %v1118_v13  ;;  %v1137_v62 = vand.u32 4294901760, %v3451_v5 }
 0x147   : > { %v3471_v50 = vand.u32 4294901760, %v977_v33  ;;  %v978_v43 = vsel %vm962_vm8, %v2640_v10, %v970_v23  ;;  %1703 = vmatprep.mubr.f32.mxu0 %v1131_v49  ;;  %1125 = vmatmul.mubr.f32.vlgmr.msra.gmra.mrb[8].mxu1 %v1124_v45  ;;  %v1132_v26 = vsub.f32 %v3454_v60, %v1131_v49  ;;  %v1152_v55 = vand.u32 4294901760, %v3463_v31  ;;  %v3809_v49 = vld [vmem:[#allocation4_spill] sm:$0xff] }
 0x148   : > { %v3475_v4 = vand.u32 4294901760, %v978_v43  ;;  %2468 = vmatpush3.bf16.msra.mxu1 %v3256_v2  ;;  %1707 = vmatmul.mubr.f32.gmra.mrb[10].mxu0 %v1137_v62  ;;  %v1146_v8 = vand.u32 4294901760, %v3468_v39  ;;  %v1138_v30 = vsub.f32 %v3451_v5, %v1137_v62  ;;  %v3810_v62 = vld [vmem:[#allocation5_spill] sm:$0xff] }
 0x149   : > { %v3481_v58 = vsub.f32 %v977_v33, %v3471_v50  ;;  %2600 = vmatpush3.bf16.msra.mxu0 %v3040_v29  ;;  %v1133_v48 = vand.u32 4294901760, %v1132_v26  ;;  %2470 = vmatprep.subr.bf16.mxu1 %v3290_v17  ;;  %v1153_v32 = vsub.f32 %v3463_v31, %v1152_v55  ;;  %v3808_v17 = vld [vmem:[#allocation3_spill] sm:$0xff] }
 0x14a   : > { %v3486_v61 = vsub.f32 %v978_v43, %v3475_v4  ;;  %1714 = vmatprep.mubr.f32.mxu0 %v1146_v8  ;;  %2602 = vmatprep.subr.bf16.mxu0 %v3048_v24  ;;  %v1139_v2 = vand.u32 4294901760, %v1138_v30  ;;  %v1147_v45 = vsub.f32 %v3468_v39, %v1146_v8  ;;  %v3812_v43 = vld [vmem:[#allocation7_spill] sm:$0xff]  ;;  %v3817_v8 = vld [vmem:[#allocation13_spill] sm:$0xff]  ;;  %v3826_v30 = vpack.c.bf16 %v3044_v27, %v3042_v28 }
 0x14b   : > { %1134 = vmatprep.mubr.f32.mxu1 %v1133_v48  ;;  %v1167_v10 = vand.u32 4294901760, %v3481_v58  ;;  %v1154_v24 = vand.u32 4294901760, %v1153_v32  ;;  %v3814_v26 = vld [vmem:[#allocation11_spill] sm:$0xff]  ;;  %v3827_v48 = vpack.c.bf16 %v3050_v59, %v3046_v25  ;;  %v3830_v32 = vld [vmem:[#allocation9_spill] sm:$0xff] }
 0x14c   : > { %1140 = vmatmul.mubr.f32.gmra.mrb[10].mxu1 %v1139_v2  ;;  %1718 = vmatmul.mubr.f32.gmra.mrb[12].mxu0 %v1152_v55  ;;  %v1148_v29 = vand.u32 4294901760, %v1147_v45  ;;  %v1161_v15 = vand.u32 4294901760, %v3486_v61  ;;  %v3816_v55 = vld [vmem:[#allocation28_spill] sm:$0xff]  ;;  %v3828_v2 = vld [vmem:[#allocation2_spill] sm:$0xff] }
 0x14d   : > { %2472 = vmatpush3.bf16.msra.mxu1 %v3293_v9  ;;  %2604 = vmatpush3.bf16.msra.mxu0 %v3808_v17  ;;  %v1168_v23 = vsub.f32 %v3481_v58, %v1167_v10  ;;  %v3829_v45 = vpack.c.bf16 %v3058_v36, %v3828_v2  ;;  %v3834_v17 = vld [vmem:[#allocation16_spill] sm:$0xff] }
 0x14e   : > { %1149 = vmatprep.mubr.f32.mxu1 %v1148_v29  ;;  %2474 = vmatprep.subr.bf16.mxu1 %v3296_v1  ;;  %v1162_v13 = vsub.f32 %v3486_v61, %v1161_v15  ;;  %v3811_v1 = vld [vmem:[#allocation6_spill] sm:$0xff] }
 0x14f   : > { %1725 = vmatprep.mubr.f32.mxu0 %v1161_v15  ;;  %2606 = vmatprep.subr.bf16.mxu0 %v3809_v49  ;;  %v1169_v9 = vand.u32 4294901760, %v1168_v23  ;;  %v3833_v15 = vld [vmem:[#allocation17_spill] sm:$0xff]  ;;  %v3837_v23 = vld [vmem:[#allocation18_spill] sm:$0xff] }
 0x150   : > { %1155 = vmatmul.mubr.f32.gmra.mrb[12].mxu1 %v1154_v24  ;;  %1729 = vmatmul.mubr.f32.gmra.mrb[14].mxu0 %v1167_v10  ;;  %v1163_v33 = vand.u32 4294901760, %v1162_v13  ;;  %v3831_v10 = vld [vmem:[#allocation8_spill] sm:$0xff]  ;;  %v3835_v24 = vpack.c.bf16 %v3833_v15, %v3834_v17  ;;  %v3836_v13 = vld [vmem:[#allocation19_spill] sm:$0xff] }
 0x151   : > { %2476 = vmatpush3.bf16.msra.mxu1 %v3303_v37  ;;  %2608 = vmatpush3.bf16.msra.mxu0 %v3810_v62  ;;  %v3813_v37 = vld [vmem:[#allocation10_spill] sm:$0xff]  ;;  %v3832_v29 = vpack.c.bf16 %v3830_v32, %v3831_v10  ;;  %v3838_v49 = vpack.c.bf16 %v3836_v13, %v3837_v23  ;;  %v3840_v62 = vld [vmem:[#allocation20_spill] sm:$0xff] }
 0x152   : > { %2020 = vmatprep.mubr.f32.mxu0 %v3435_v42  ;;  %1164 = vmatprep.mubr.f32.mxu1 %v1163_v33  ;;  %v3839_v33 = vld [vmem:[#allocation21_spill] sm:$0xff] }
 0x153   : > { %2478 = vmatprep.subr.bf16.mxu1 %v3321_v34  ;;  %2610 = vmatprep.subr.bf16.mxu0 %v3811_v1  ;;  %v3815_v34 = vld [vmem:[#allocation12_spill] sm:$0xff]  ;;  %v3843_v1 = vld [vmem:[#allocation22_spill] sm:$0xff] }
 0x154   : > { %1170 = vmatmul.mubr.f32.gmra.mrb[14].mxu1 %v1169_v9  ;;  %v3841_v9 = vpack.c.bf16 %v3839_v33, %v3840_v62 }
 0x155   : > { %2480 = vmatpush3.bf16.msra.mxu1 %v3332_v14  ;;  %2612 = vmatpush3.bf16.msra.mxu0 %v3812_v43  ;;  %v3818_v14 = vld [vmem:[#allocation14_spill] sm:$0xff] }
 0x156   : > { %1400 = vmatprep.mubr.f32.mxu1 %v3435_v42  ;;  %2482 = vmatprep.subr.bf16.mxu1 %v3344_v3  ;;  %v3819_v3 = vld [vmem:[#allocation15_spill] sm:$0xff] }
 0x157   : > { %2614 = vmatprep.subr.bf16.mxu0 %v3813_v37  ;;  %v3845_v37 = vld [vmem:[#allocation25_spill] sm:$0xff] }
 0x159   : > { %2484 = vmatpush3.bf16.msra.mxu1 %v3346_v38  ;;  %2616 = vmatpush3.bf16.msra.mxu0 %v3814_v26  ;;  %v3820_v38 = vpack.c.bf16 %v2957_v22, %v2955_v18  ;;  %v3846_v26 = vld [vmem:[#allocation24_spill] sm:$0xff] }
 0x15a   : > { %2486 = vmatprep.subr.bf16.mxu1 %v3358_v47  ;;  %2618 = vmatprep.subr.bf16.mxu0 %v3815_v34  ;;  %v3821_v47 = vpack.c.bf16 %v2980_v63, %v2969_v52  ;;  %v3847_v34 = vpack.c.bf16 %v3845_v37, %v3846_v26 }
 0x15d   : > { %2488 = vmatpush3.bf16.msra.mxu1 %v3816_v55  ;;  %2620 = vmatpush3.bf16.msra.mxu0 %v3817_v8  ;;  %v3848_v55 = vand.u32 4294901760, %v2955_v18  ;;  %v3849_v8 = vand.u32 4294901760, %v2957_v22  ;;  %v3857_v18 = vand.u32 4294901760, %v2999_v12  ;;  %v3858_v22 = vand.u32 4294901760, %v3010_v44 }
 0x15e   : > { %2490 = vmatprep.subr.bf16.mxu1 %v3384_v51  ;;  %2622 = vmatprep.subr.bf16.mxu0 %v3818_v14  ;;  %v3824_v51 = vpack.c.bf16 %v3022_v46, %v3020_v40 }
 0x15f   : > { %v2561_v14 = vpack.c.bf16 %v3849_v8, %v3848_v55 }
 0x161   : > { %2492 = vmatpush3.bf16.msra.mxu1 %v3386_v20  ;;  %2624 = vmatpush3.bf16.msra.mxu0 %v3819_v3  ;;  %v3825_v20 = vpack.c.bf16 %v3037_v57, %v3035_v54  ;;  %v3850_v3 = vld [vmem:[#allocation27_spill] sm:$0xff] }
 0x162   : > { %2494 = vmatprep.subr.bf16.mxu1 %v3394_v41  ;;  %v3822_v41 = vpack.c.bf16 %v2996_v11, %v2994_v7 }
 0x164   : > { %2022 = vmatmul.mubr.f32.vlgmr.msra.gmra.mrb[16].mxu0 %v3433_v53 }
 0x165   : > { %2496 = vmatpush3.bf16.msra.mxu1 %v3396_v19  ;;  %2027 = vmatprep.mubr.f32.mxu0 %v3446_v0  ;;  %v3823_v19 = vpack.c.bf16 %v3010_v44, %v2999_v12  ;;  %v3863_v12 = vand.u32 4294901760, %v3042_v28  ;;  %v3864_v44 = vand.u32 4294901760, %v3044_v27  ;;  %v3869_v27 = vand.u32 4294901760, %v3831_v10 }
 0x166   : > { %2498 = vmatprep.subr.bf16.mxu1 %v3820_v38  ;;  %v3851_v38 = vld [vmem:[#allocation26_spill] sm:$0xff]  ;;  %v3870_v28 = vand.u32 4294901760, %v3830_v32  ;;  %v3876_v10 = vand.u32 4294901760, %v3839_v33  ;;  %v3877_v32 = vand.u32 4294901760, %v3843_v1 }
 0x168   : > { %1402 = vmatmul.mubr.f32.vlgmr.msra.gmra.mrb[16].mxu1 %v3433_v53  ;;  %2029 = vmatmul.mubr.f32.gmra.mrb[18].mxu0 %v3444_v35 }
 0x169   : > { %1407 = vmatprep.mubr.f32.mxu1 %v3446_v0  ;;  %2500 = vmatpush3.bf16.msra.mxu1 %v3821_v47  ;;  %v3852_v47 = vpack.c.bf16 %v3850_v3, %v3851_v38 }
 0x16a   : > { %2034 = vmatprep.mubr.f32.mxu0 %v3459_v16  ;;  %2502 = vmatprep.subr.bf16.mxu1 %v3822_v41  ;;  %v3853_v41 = vand.u32 4294901760, %v2969_v52  ;;  %v3859_v52 = vand.u32 4294901760, %v3020_v40  ;;  %v3865_v40 = vand.u32 4294901760, %v3046_v25  ;;  %v3871_v25 = vand.u32 4294901760, %v3834_v17 }
 0x16c   : > { %1409 = vmatmul.mubr.f32.gmra.mrb[18].mxu1 %v3444_v35  ;;  %2036 = vmatmul.mubr.f32.gmra.mrb[20].mxu0 %v3457_v21 }
 0x16d   : > { %1414 = vmatprep.mubr.f32.mxu1 %v3459_v16  ;;  %2504 = vmatpush3.bf16.msra.mxu1 %v3823_v19  ;;  %v3854_v19 = vand.u32 4294901760, %v2980_v63  ;;  %v3860_v63 = vand.u32 4294901760, %v3022_v46  ;;  %v3866_v46 = vand.u32 4294901760, %v3050_v59  ;;  %v3872_v59 = vand.u32 4294901760, %v3833_v15 }
 0x16e   : > { %2041 = vmatprep.mubr.f32.mxu0 %v3475_v4  ;;  %2506 = vmatprep.subr.bf16.mxu1 %v3824_v51  ;;  %v3879_v15 = vand.u32 4294901760, %v3846_v26 }
 0x16f   : > { %v2563_v51 = vpack.c.bf16 %v3854_v19, %v3853_v41 }
 0x170   : > { %1416 = vmatmul.mubr.f32.gmra.mrb[20].mxu1 %v3457_v21  ;;  %2043 = vmatmul.mubr.f32.gmra.mrb[22].mxu0 %v3471_v50 }
 0x171   : > { %1421 = vmatprep.mubr.f32.mxu1 %v3475_v4  ;;  %2508 = vmatpush3.bf16.msra.mxu1 %v3825_v20  ;;  %v3855_v20 = vand.u32 4294901760, %v2994_v7  ;;  %v3861_v7 = vand.u32 4294901760, %v3035_v54  ;;  %v3867_v54 = vand.u32 4294901760, %v3828_v2  ;;  %v3874_v2 = vand.u32 4294901760, %v3836_v13 }
 0x172   : > { %2510 = vmatprep.subr.bf16.mxu1 %v3826_v30  ;;  %v3856_v30 = vand.u32 4294901760, %v2996_v11  ;;  %v3862_v11 = vand.u32 4294901760, %v3037_v57  ;;  %v3868_v57 = vand.u32 4294901760, %v3058_v36  ;;  %v3873_v36 = vand.u32 4294901760, %v3837_v23 }
 0x173   : > { %v3880_v23 = vand.u32 4294901760, %v3845_v37  ;;  %v3881_v13 = vand.u32 4294901760, %v3851_v38 }
 0x174   : > { %1423 = vmatmul.mubr.f32.gmra.mrb[22].mxu1 %v3471_v50 }
 0x175   : > { %2512 = vmatpush3.bf16.msra.mxu1 %v3827_v48  ;;  %1558 = vmatprep.mubr.f32.mxu1 %v3441_v56  ;;  %v3842_v56 = vld [vmem:[#allocation23_spill] sm:$0xff]  ;;  %v2565_v48 = vpack.c.bf16 %v3856_v30, %v3855_v20 }
 0x176   : > { %2514 = vmatprep.subr.bf16.mxu1 %v3829_v45  ;;  %v3844_v43 = vpack.c.bf16 %v3842_v56, %v3843_v1  ;;  %v2567_v45 = vpack.c.bf16 %v3858_v22, %v3857_v18  ;;  %v3878_v17 = vand.u32 4294901760, %v3842_v56 }
 0x179   : > { %2516 = vmatpush3.bf16.msra.mxu1 %v3832_v29  ;;  %v2569_v29 = vpack.c.bf16 %v3860_v63, %v3859_v52 }
 0x17a   : > { %2518 = vmatprep.subr.bf16.mxu1 %v3835_v24 }
 0x17d   : > { %2520 = vmatpush3.bf16.msra.mxu1 %v3838_v49  ;;  %v2587_v49 = vpack.c.bf16 %v3878_v17, %v3877_v32 }
 0x17e   : > { %2522 = vmatprep.subr.bf16.mxu1 %v3841_v9  ;;  %v2589_v9 = vpack.c.bf16 %v3880_v23, %v3879_v15 }
 0x181   : > { %2524 = vmatpush3.bf16.msra.mxu1 %v3844_v43 }
 0x182   : > { %2526 = vmatprep.subr.bf16.mxu1 %v3847_v34 }
 0x185   : > { %2528 = vmatpush3.bf16.msra.mxu1 %v3852_v47 }
 0x186   : > { %2562 = vmatprep.subr.bf16.mxu1 %v2561_v14 }
 0x188   : > { %1561 = vmatmul.mubr.f32.vlgmr.msra.gmra.mrb[24].mxu1 %v3438_v6  ;;  %v2571_v6 = vpack.c.bf16 %v3862_v11, %v3861_v7 }
 0x189   : > { %1567 = vmatprep.mubr.f32.mxu1 %v3454_v60  ;;  %2564 = vmatpush3.bf16.msra.mxu1 %v2563_v51  ;;  %v2573_v60 = vpack.c.bf16 %v3864_v44, %v3863_v12 }
 0x18a   : > { %2566 = vmatprep.subr.bf16.mxu1 %v2565_v48 }
 0x18c   : > { %1570 = vmatmul.mubr.f32.gmra.mrb[26].mxu1 %v3451_v5  ;;  %v2575_v5 = vpack.c.bf16 %v3866_v46, %v3865_v40 }
 0x18d   : > { %1576 = vmatprep.mubr.f32.mxu1 %v3468_v39  ;;  %2568 = vmatpush3.bf16.msra.mxu1 %v2567_v45  ;;  %v2577_v39 = vpack.c.bf16 %v3868_v57, %v3867_v54  ;;  %v2118_v45 = vld [vmem:[%s3682_s4] ss:$0 sm:$0xff] }
 0x18e   : > { %2570 = vmatprep.subr.bf16.mxu1 %v2569_v29 }
 0x190   : > { %1579 = vmatmul.mubr.f32.gmra.mrb[28].mxu1 %v3463_v31  ;;  %v2579_v31 = vpack.c.bf16 %v3870_v28, %v3869_v27 }
 0x191   : > { %1585 = vmatprep.mubr.f32.mxu1 %v3486_v61  ;;  %2572 = vmatpush3.bf16.msra.mxu1 %v2571_v6  ;;  %v2581_v61 = vpack.c.bf16 %v3872_v59, %v3871_v25 }
 0x192   : > { %2574 = vmatprep.subr.bf16.mxu1 %v2573_v60 }
 0x194   : > { %1588 = vmatmul.mubr.f32.gmra.mrb[30].mxu1 %v3481_v58  ;;  %v2583_v58 = vpack.c.bf16 %v3874_v2, %v3873_v36 }
 0x195   : > { %2576 = vmatpush3.bf16.msra.mxu1 %v2575_v5  ;;  %1895 = vmatprep.mubr.f32.mxu1 %v3435_v42  ;;  %v3875_v42 = vand.u32 4294901760, %v3840_v62  ;;  %v3882_v62 = vand.u32 4294901760, %v3850_v3 }
 0x196   : > { %2578 = vmatprep.subr.bf16.mxu1 %v2577_v39 }
 0x197   : > { %v2585_v24 = vpack.c.bf16 %v3876_v10, %v3875_v42  ;;  %v2591_v43 = vpack.c.bf16 %v3882_v62, %v3881_v13 }
 0x199   : > { %2580 = vmatpush3.bf16.msra.mxu1 %v2579_v31 }
 0x19a   : > { %2582 = vmatprep.subr.bf16.mxu1 %v2581_v61 }
 0x19d   : > { %2584 = vmatpush3.bf16.msra.mxu1 %v2583_v58 }
 0x19e   : > { %2586 = vmatprep.subr.bf16.mxu1 %v2585_v24 }
 0x1a1   : > { %2588 = vmatpush3.bf16.msra.mxu1 %v2587_v49 }
 0x1a2   : > { %2590 = vmatprep.subr.bf16.mxu1 %v2589_v9 }
 0x1a5   : > { %2592 = vmatpush3.bf16.msra.mxu1 %v2591_v43 }
 0x1a8   : > { %1897 = vmatmul.mubr.f32.vlgmr.msra.gmra.mrb[32].mxu1 %v3433_v53 }
 0x1a9   : > { %1902 = vmatprep.mubr.f32.mxu1 %v3446_v0 }
 0x1ac   : > { %1904 = vmatmul.mubr.f32.gmra.mrb[34].mxu1 %v3444_v35 }
 0x1ad   : > { %1909 = vmatprep.mubr.f32.mxu1 %v3459_v16 }
 0x1b0   : > { %1911 = vmatmul.mubr.f32.gmra.mrb[36].mxu1 %v3457_v21 }
 0x1b1   : > { %1916 = vmatprep.mubr.f32.mxu1 %v3475_v4 }
 0x1b4   : > { %1918 = vmatmul.mubr.f32.gmra.mrb[38].mxu1 %v3471_v50 }
 0x216   : > { %v2285_v33 = vpop.f32.mrb[8].mxu0 }
 0x217   : > { %v2286_v56 = vpop.f32.mrb[9].mxu0 }
 0x218   : > { %v2287_v1 = vadd.f32 %v2286_v56, %v2285_v33 }
 0x21a   : > { %v2153_v37 = vpop.f32.mrb[8].mxu1 }
 0x21b   : > { %v2288_v26 = vpop.f32.mrb[10].mxu0  ;;  %v2154_v34 = vpop.f32.mrb[9].mxu1 }
 0x21c   : > { %v2155_v55 = vadd.f32 %v2154_v34, %v2153_v37  ;;  %v2289_v53 = vpop.f32.mrb[11].mxu0 }
 0x21d   : > { %v2290_v8 = vadd.f32 %v2289_v53, %v2288_v26 }
 0x21e   : > { %v1127_v11 = vadd.f32 %v2155_v55, %v2118_v45 }
 0x21f   : > { %v2156_v0 = vpop.f32.mrb[10].mxu1  ;;  %v2291_v14 = vpop.f32.mrb[12].mxu0 }
 0x220   : > { %v2157_v35 = vpop.f32.mrb[11].mxu1  ;;  %v2292_v3 = vpop.f32.mrb[13].mxu0 }
 0x221   : > { %v2158_v16 = vadd.f32 %v2157_v35, %v2156_v0  ;;  %v2293_v38 = vadd.f32 %v2292_v3, %v2291_v14 }
 0x223   : > { %v2159_v21 = vpop.f32.mrb[12].mxu1  ;;  %v2294_v47 = vpop.f32.mrb[14].mxu0  ;;  %v1142_v54 = vadd.f32 %v2158_v16, %v2118_v45 }
 0x224   : > { %v2160_v4 = vpop.f32.mrb[13].mxu1  ;;  %v2295_v41 = vpop.f32.mrb[15].mxu0 }
 0x225   : > { %v2161_v50 = vadd.f32 %v2160_v4, %v2159_v21  ;;  %v2296_v19 = vadd.f32 %v2295_v41, %v2294_v47 }
 0x227   : > { %v2162_v51 = vpop.f32.mrb[14].mxu1  ;;  %v1157_v61 = vadd.f32 %v2161_v50, %v2118_v45 }
 0x228   : > { %v2163_v20 = vpop.f32.mrb[15].mxu1 }
 0x229   : > { %v2164_v30 = vadd.f32 %v2163_v20, %v2162_v51 }
 0x22b   : > { %v1172_v24 = vadd.f32 %v2164_v30, %v2118_v45 }
 0x237   : > { %v2373_v48 = vpop.f32.mrb[16].mxu0 }
 0x238   : > { %v2374_v18 = vpop.f32.mrb[17].mxu0 }
 0x239   : > { %v2375_v22 = vadd.f32 %v2374_v18, %v2373_v48 }
 0x23b   : > { %v2197_v52 = vpop.f32.mrb[16].mxu1  ;;  %v2376_v63 = vpop.f32.mrb[18].mxu0 }
 0x23c   : > { %v2198_v29 = vpop.f32.mrb[17].mxu1  ;;  %v2377_v7 = vpop.f32.mrb[19].mxu0 }
 0x23d   : > { %v2199_v6 = vadd.f32 %v2198_v29, %v2197_v52  ;;  %v2378_v12 = vadd.f32 %v2377_v7, %v2376_v63 }
 0x23f   : > { %v1404_v44 = vadd.f32 %v2199_v6, %v1127_v11  ;;  %v2200_v60 = vpop.f32.mrb[18].mxu1  ;;  %v2379_v40 = vpop.f32.mrb[20].mxu0 }
 0x240   : > { %v2201_v46 = vpop.f32.mrb[19].mxu1  ;;  %v2380_v5 = vpop.f32.mrb[21].mxu0 }
 0x241   : > { %v2202_v57 = vadd.f32 %v2201_v46, %v2200_v60  ;;  %v2381_v39 = vadd.f32 %v2380_v5, %v2379_v40 }
 0x243   : > { %v1411_v27 = vadd.f32 %v2202_v57, %v1142_v54  ;;  %v2203_v28 = vpop.f32.mrb[20].mxu1  ;;  %v2382_v31 = vpop.f32.mrb[22].mxu0 }
 0x244   : > { %v2204_v25 = vpop.f32.mrb[21].mxu1  ;;  %v2383_v59 = vpop.f32.mrb[23].mxu0 }
 0x245   : > { %v2205_v36 = vadd.f32 %v2204_v25, %v2203_v28  ;;  %v2384_v2 = vadd.f32 %v2383_v59, %v2382_v31 }
 0x247   : > { %v1418_v58 = vadd.f32 %v2205_v36, %v1157_v61  ;;  %v2206_v42 = vpop.f32.mrb[22].mxu1 }
 0x248   : > { %v2207_v10 = vpop.f32.mrb[23].mxu1 }
 0x249   : > { %v2208_v32 = vadd.f32 %v2207_v10, %v2206_v42 }
 0x24b   : > { %v1425_v17 = vadd.f32 %v2208_v32, %v1172_v24 }
 0x25b   : > { %v2241_v49 = vpop.f32.mrb[24].mxu1 }
 0x25c   : > { %v2242_v15 = vpop.f32.mrb[25].mxu1 }
 0x25d   : > { %v2243_v23 = vadd.f32 %v2242_v15, %v2241_v49 }
 0x25f   : > { %v1563_v9 = vadd.f32 %v2243_v23, %v1404_v44  ;;  %v2244_v13 = vpop.f32.mrb[26].mxu1 }
 0x260   : > { %v2245_v62 = vpop.f32.mrb[27].mxu1 }
 0x261   : > { %v2246_v43 = vadd.f32 %v2245_v62, %v2244_v13  ;;  %v1698_v33 = vadd.f32 %v2287_v1, %v1563_v9 }
 0x263   : > { %v1572_v56 = vadd.f32 %v2246_v43, %v1411_v27  ;;  %v2247_v37 = vpop.f32.mrb[28].mxu1 }
 0x264   : > { %v2248_v26 = vpop.f32.mrb[29].mxu1 }
 0x265   : > { %v2249_v34 = vadd.f32 %v2248_v26, %v2247_v37  ;;  %v1709_v55 = vadd.f32 %v2290_v8, %v1572_v56 }
 0x267   : > { %v1581_v53 = vadd.f32 %v2249_v34, %v1418_v58  ;;  %v2250_v0 = vpop.f32.mrb[30].mxu1 }
 0x268   : > { %v2251_v14 = vpop.f32.mrb[31].mxu1 }
 0x269   : > { %v2252_v35 = vadd.f32 %v2251_v14, %v2250_v0  ;;  %v1720_v3 = vadd.f32 %v2293_v38, %v1581_v53 }
 0x26b   : > { %v1590_v16 = vadd.f32 %v2252_v35, %v1425_v17 }
 0x26d   : > { %v1731_v21 = vadd.f32 %v2296_v19, %v1590_v16 }
 0x27b   : > { %v2329_v47 = vpop.f32.mrb[32].mxu1 }
 0x27c   : > { %v2330_v4 = vpop.f32.mrb[33].mxu1 }
 0x27d   : > { %v2331_v41 = vadd.f32 %v2330_v4, %v2329_v47 }
 0x27f   : > { %v1899_v50 = vadd.f32 %v2331_v41, %v1698_v33  ;;  %v2332_v51 = vpop.f32.mrb[34].mxu1 }
 0x280   : > { %v2333_v1 = vpop.f32.mrb[35].mxu1 }
 0x281   : > { %v2024_v8 = vadd.f32 %v2375_v22, %v1899_v50  ;;  %v2334_v20 = vadd.f32 %v2333_v1, %v2332_v51 }
 0x283   : > { %2049 = vst.msk [vmem:[%s226_s21] sm:$0xff] %vm2048_vm9, %v2024_v8  ;;  %v1906_v30 = vadd.f32 %v2334_v20, %v1709_v55  ;;  %v2335_v38 = vpop.f32.mrb[36].mxu1 }
 0x284   : > { %v2336_v48 = vpop.f32.mrb[37].mxu1 }
 0x285   : > { %v2031_v19 = vadd.f32 %v2378_v12, %v1906_v30  ;;  %v2337_v18 = vadd.f32 %v2336_v48, %v2335_v38 }
 0x287   : > { %2050 = vst.msk [vmem:[%s226_s21 + $0x8] sm:$0xff] %vm2048_vm9, %v2031_v19  ;;  %v1913_v45 = vadd.f32 %v2337_v18, %v1720_v3  ;;  %v2338_v52 = vpop.f32.mrb[38].mxu1 }
 0x288   : > { %v2339_v63 = vpop.f32.mrb[39].mxu1 }
 0x289   : > { %v2038_v29 = vadd.f32 %v2381_v39, %v1913_v45  ;;  %v2340_v7 = vadd.f32 %v2339_v63, %v2338_v52 }
 0x28b   : > { %2051 = vst.msk [vmem:[%s226_s21 + $0x10] sm:$0xff] %vm2048_vm9, %v2038_v29  ;;  %v1920_v11 = vadd.f32 %v2340_v7, %v1731_v21 }
 0x28d   : > { %v2045_v6 = vadd.f32 %v2384_v2, %v1920_v11 }
 0x28f   : > { %2052 = vst.msk [vmem:[%s226_s21 + $0x18] sm:$0xff] %vm2048_vm9, %v2045_v6 }
 0x290 PF: > { %s15_s18 = sadd.s32 1, %s2688_s18  }
 0x291   : > { %p12_p4 = scmp.ge.s32.totalorder %s15_s18, 4  }
 0x293   :  { %14 = sbr.rel (!%p12_p4) target bundleno = 1 (0x1), region = 70 }

</bundles_post_ra>
